<compile_context>
chip_gen: v7x
topology: tpu7x:2x2x1
jax: 0.10.0
libtpu: 0.0.40
codegen_flags: <defaults>
</compile_context>

<pallas_src>
import numpy as np
import jax
import jax.numpy as jnp
from jax import lax
from jax.experimental import pallas as pl
from jax.experimental.pallas import tpu as pltpu


# ----------------------------------------------------------------------------
# MPConv1D weight preprocessing (EDM2 magnitude-preserving), kept in f32.
# ----------------------------------------------------------------------------
def _mp_weight_f32(w, gain=1.0, eps=1e-4):
    """w: (out_ch, in_ch, k) -> normalized & scaled weight, float32."""
    w32 = w.astype(jnp.float32)
    fan_in = w.shape[1] * w.shape[2]
    norm = jnp.sqrt(jnp.sum(w32 * w32, axis=(1, 2), keepdims=True))
    norm = eps + norm * (1.0 / np.sqrt(fan_in))
    return (w32 / norm) * (gain / np.sqrt(fan_in))


# ----------------------------------------------------------------------------
# Generation-aware defaults (block budget, scoped-VMEM cap, MXU K-fill).
# ----------------------------------------------------------------------------
def _tpu_profile():
    kind = ""
    try:
        kind = jax.devices()[0].device_kind.lower()
    except Exception:
        pass
    if ("v5 lite" in kind) or ("v5e" in kind) or ("v5lite" in kind):
        # 128 MiB VMEM, 4x128^2 MXU: big blocks, keep K=Cp (pooled form).
        return dict(max_block_bytes=12 << 20, vmem_cap=56 << 20, mxu_k_fill=False)
    if ("v7" in kind) or ("tpu7" in kind) or ("7x" in kind):
        # 64 MiB VMEM per TensorCore: smaller blocks + tighter scoped-VMEM cap.
        return dict(max_block_bytes=4 << 20, vmem_cap=28 << 20, mxu_k_fill=True)
    # v6e / v5p / v4 default: plenty of VMEM, 256-wide MXU on v6e.
    return dict(max_block_bytes=8 << 20, vmem_cap=48 << 20, mxu_k_fill=True)


# ----------------------------------------------------------------------------
# Kernels.  Both consume the pair-packed channels-last block (1, Th, 2*Cp) and
# emit a channels-first, lane-dense (1, Cp, Th) block.  No transposes, no
# strided loads; the contraction is the MXU-native A @ B^T form.
# ----------------------------------------------------------------------------
def _downsample_kernel_kfill(x_ref, w_ref, o_ref):
    # x_ref: (1, Th, 2*Cp); w_ref: (Cp, 2*Cp) = 0.5*[Wf | Wf]; o_ref: (1, Cp, Th)
    out = lax.dot_general(
        w_ref[...], x_ref[0],
        dimension_numbers=(((1,), (1,)), ((), ())),
        preferred_element_type=jnp.float32)
    o_ref[0] = out.astype(o_ref.dtype)


def _downsample_kernel_pooled(x_ref, w_ref, o_ref):
    # x_ref: (1, Th, 2*Cp); w_ref: (Cp, Cp) = 0.5*Wf; o_ref: (1, Cp, Th)
    # Even/odd timesteps are the two contiguous 128-aligned lane halves.
    cp = w_ref.shape[0]
    xr = x_ref[0]
    pooled = xr[:, :cp] + xr[:, cp:]                   # (Th, Cp); 0.5 is in w
    out = lax.dot_general(
        w_ref[...], pooled,
        dimension_numbers=(((1,), (1,)), ((), ())),
        preferred_element_type=jnp.float32)
    o_ref[0] = out.astype(o_ref.dtype)


# ----------------------------------------------------------------------------
# Tiling: tile_half divides half_pad, is a multiple of 128 (lane-dense output
# stores) unless it covers the whole short axis, and the input block stays
# within the per-generation block budget.  Ragged lengths are padded up.
# ----------------------------------------------------------------------------
def _choose_time_tiling(half, c_pad, itemsize, max_block_bytes, n_batch):
    max_th = max(128, (max_block_bytes // (2 * c_pad * itemsize)) // 128 * 128)
    if half <= max_th:
        half_pad, tile_half = half, half
    else:
        tile_half = 0
        t = max_th
        while t >= 128:
            if half % t == 0:
                tile_half = t
                break
            t -= 128
        if tile_half:
            half_pad = half
        else:
            # Ragged length: pad `half` to a lane-dense multiple instead of a
            # VMEM-busting full-length fallback block.
            half_pad = -(-half // 128) * 128
            t = max_th
            while t >= 128:
                if half_pad % t == 0:
                    tile_half = t
                    break
                t -= 128
            tile_half = tile_half or 128
    # v7x megacore: avoid a degenerate single-block grid (one TensorCore idle).
    if n_batch * (half_pad // tile_half) == 1 and tile_half % 256 == 0:
        tile_half //= 2
    return half_pad, tile_half


def _const_block_spec(shape):
    """Constant-index weight block: single-buffer it when the API allows."""
    index_map = lambda n, t: (0, 0)
    try:
        return pl.BlockSpec(shape, index_map, pipeline_mode=pl.Buffered(1))
    except Exception:  # older jax without pipeline_mode/Buffered -> default buffers
        return pl.BlockSpec(shape, index_map)


# ----------------------------------------------------------------------------
# Wrapper
# ----------------------------------------------------------------------------
def downsample1d_pallas(x, w1, w2, with_conv=True, *,
                        assume_channels_last=False,
                        compute_dtype=jnp.bfloat16,
                        mxu_k_fill=None,
                        max_block_bytes=None,
                        vmem_cap=None):
    """Downsample1D forward.

    x: (N, C, L) by default (PyTorch layout); set assume_channels_last=True to
       pass (N, L, C) and skip the relayout pass entirely.
    w1, w2: raw MPConv1D weights of shape (C, C, 1).
    Returns (N, C, L // 2) in x.dtype.
    """
    if assume_channels_last:
        N, L, C = x.shape
    else:
        N, C, L = x.shape
    assert L >= 2, "need at least one pooling window"
    half = L // 2
    out_dtype = x.dtype

    if not with_conv:
        # Pure avg_pool1d: reshape+mean is already optimal in XLA; a kernel
        # would only add identity matmuls.
        assert not assume_channels_last, "channels-last path is wired for with_conv=True"
        return x[:, :, :2 * half].reshape(N, C, half, 2).mean(axis=-1).astype(out_dtype)

    # The conv1 -> pool -> conv2 fold is exact only for kernel_size-1 convs.
    assert w1.shape == (C, C, 1) and w2.shape == (C, C, 1), (
        "Downsample1D fold requires (C, C, 1) MPConv1D weights")

    prof = _tpu_profile()
    if mxu_k_fill is None:
        mxu_k_fill = prof["mxu_k_fill"]
    if max_block_bytes is None:
        max_block_bytes = prof["max_block_bytes"]
    if vmem_cap is None:
        vmem_cap = prof["vmem_cap"]

    cdt = jnp.dtype(compute_dtype) if compute_dtype is not None else jnp.dtype(out_dtype)
    itemsize = int(cdt.itemsize)
    out_itemsize = int(jnp.dtype(out_dtype).itemsize)

    # Fused magnitude-preserving weight with the avg-pool 0.5 folded in (f32).
    mp1 = _mp_weight_f32(w1)[:, :, 0]                  # (C_out, C_in)
    mp2 = _mp_weight_f32(w2)[:, :, 0]
    wf = 0.5 * jnp.dot(mp2, mp1)                       # (C, C), f32

    c_pad = -(-C // 128) * 128
    half_pad, tile_half = _choose_time_tiling(half, c_pad, itemsize,
                                              max_block_bytes, N)
    n_lt = half_pad // tile_half
    l_pad = 2 * half_pad

    if c_pad != C:
        wf = jnp.pad(wf, ((0, c_pad - C), (0, c_pad - C)))

    # ONE fused pass over x: (optional) relayout to channels-last, zero-pad
    # channels/time, cast to the compute dtype.  Then a free reshape packs each
    # pooling pair into one 2*Cp-wide row.
    if assume_channels_last:
        x_nlc = x[:, :2 * half, :]
    else:
        x_nlc = jnp.transpose(x[:, :, :2 * half], (0, 2, 1))          # (N, 2*half, C)
    x_nlc = jnp.pad(x_nlc, ((0, 0), (0, l_pad - 2 * half), (0, c_pad - C))).astype(cdt)
    x_in = x_nlc.reshape(N, half_pad, 2 * c_pad)                      # pair-packed

    x_spec = pl.BlockSpec((1, tile_half, 2 * c_pad), lambda n, t: (n, t, 0))
    if mxu_k_fill:
        # Duplicated-weight form: pooling rides on a K=2*Cp MXU contraction.
        w_in = jnp.concatenate([wf, wf], axis=1).astype(cdt)          # (Cp, 2*Cp)
        kernel = _downsample_kernel_kfill
        w_spec = _const_block_spec((c_pad, 2 * c_pad))
        w_bytes = c_pad * 2 * c_pad * itemsize
        flops = 2 * N * half_pad * c_pad * (2 * c_pad)
    else:
        # Pooled form (v5e): VPU add of the two lane halves, K=Cp matmul.
        w_in = wf.astype(cdt)                                         # (Cp, Cp)
        kernel = _downsample_kernel_pooled
        w_spec = _const_block_spec((c_pad, c_pad))
        w_bytes = c_pad * c_pad * itemsize
        flops = 2 * N * half_pad * c_pad * c_pad + 2 * N * half_pad * c_pad

    x_blk_bytes = tile_half * 2 * c_pad * itemsize
    o_blk_bytes = c_pad * tile_half * out_itemsize
    vmem_limit = int(min(max(2 * (x_blk_bytes + o_blk_bytes) + w_bytes + (8 << 20),
                             16 << 20), vmem_cap))

    cost = pl.CostEstimate(
        flops=int(flops),
        transcendentals=0,
        bytes_accessed=int(N * l_pad * c_pad * itemsize                 # read x
                           + w_bytes                                    # read weight
                           + N * half_pad * c_pad * out_itemsize))      # write out

    out_pad = pl.pallas_call(
        kernel,
        out_shape=jax.ShapeDtypeStruct((N, c_pad, half_pad), out_dtype),
        grid_spec=pltpu.PrefetchScalarGridSpec(
            num_scalar_prefetch=0,
            grid=(N, n_lt),
            in_specs=[x_spec, w_spec],
            out_specs=pl.BlockSpec((1, c_pad, tile_half), lambda n, t: (n, 0, t)),
        ),
        compiler_params=pltpu.CompilerParams(
            dimension_semantics=("parallel", "parallel"),
            vmem_limit_bytes=vmem_limit,
        ),
        cost_estimate=cost,
    )(x_in, w_in)

    return out_pad[:, :C, :half]


# ----------------------------------------------------------------------------
# Pure-JAX reference mirroring the PyTorch forward (NCL layout, f32).
# ----------------------------------------------------------------------------
def _reference(x, w1, w2, with_conv=True):
    x = x.astype(jnp.float32)
    if with_conv:
        x = jnp.einsum("oc,ncl->nol", _mp_weight_f32(w1)[:, :, 0], x)
    half = x.shape[-1] // 2
    x = 0.5 * (x[:, :, 0:2 * half:2] + x[:, :, 1:2 * half:2])   # F.avg_pool1d(2, 2)
    if with_conv:
        x = jnp.einsum("oc,ncl->nol", _mp_weight_f32(w2)[:, :, 0], x)
    return x


if __name__ == "__main__":
    key = jax.random.PRNGKey(0)

    # Case 1: tiny module-like shapes (channel-padding path), both kernel forms.
    N, C, L = 2, 8, 16
    kx, k1, k2, key = jax.random.split(key, 4)
    x = jax.random.normal(kx, (N, C, L), dtype=jnp.float32)
    w1 = jax.random.normal(k1, (C, C, 1), dtype=jnp.float32)
    w2 = jax.random.normal(k2, (C, C, 1), dtype=jnp.float32)
    ref = np.asarray(_reference(x, w1, w2, True))

    out = jax.block_until_ready(downsample1d_pallas(x, w1, w2, True))   # auto form, bf16
    assert out.shape == (N, C, L // 2), out.shape
    np.testing.assert_allclose(np.asarray(out), ref, rtol=3e-2, atol=3e-2)

    for k_fill in (True, False):   # exercise both kernel bodies regardless of chip gen
        o = jax.block_until_ready(
            downsample1d_pallas(x, w1, w2, True, mxu_k_fill=k_fill))
        np.testing.assert_allclose(np.asarray(o), ref, rtol=3e-2, atol=3e-2)

    # f32 compute path stays tight vs. the reference.
    o32 = jax.block_until_ready(
        downsample1d_pallas(x, w1, w2, True, compute_dtype=jnp.float32))
    np.testing.assert_allclose(np.asarray(o32), ref, rtol=1e-4, atol=1e-5)

    # Channels-last input path (no relayout pass over x at all).
    x_cl = jnp.transpose(x, (0, 2, 1))
    o_cl = jax.block_until_ready(
        downsample1d_pallas(x_cl, w1, w2, True, assume_channels_last=True))
    np.testing.assert_allclose(np.asarray(o_cl), ref, rtol=3e-2, atol=3e-2)

    # with_conv=False fast path (pure avg-pool, no kernel).
    o_nc = jax.block_until_ready(downsample1d_pallas(x, w1, w2, False))
    np.testing.assert_allclose(np.asarray(o_nc),
                               np.asarray(_reference(x, w1, w2, False)),
                               rtol=1e-5, atol=1e-6)

    # Case 2: lane-aligned channels, multi-tile time grid (forced small blocks).
    N2, C2, L2 = 2, 128, 512
    kx2, k12, k22, key = jax.random.split(key, 4)
    x2 = jax.random.normal(kx2, (N2, C2, L2), dtype=jnp.float32)
    w12 = jax.random.normal(k12, (C2, C2, 1), dtype=jnp.float32)
    w22 = jax.random.normal(k22, (C2, C2, 1), dtype=jnp.float32)
    ref2 = np.asarray(_reference(x2, w12, w22, True))
    for k_fill in (True, False):
        o2 = jax.block_until_ready(
            downsample1d_pallas(x2, w12, w22, True, mxu_k_fill=k_fill,
                                max_block_bytes=64 * 1024))   # forces 2 time tiles
        assert o2.shape == (N2, C2, L2 // 2), o2.shape
        np.testing.assert_allclose(np.asarray(o2), ref2, rtol=3e-2, atol=3e-2)

    # Ragged time length -> zero-padded, lane-dense tiles (no oversized fallback).
    L3 = 2 * 200
    x3 = jax.random.normal(key, (2, C2, L3), dtype=jnp.float32)
    ref3 = np.asarray(_reference(x3, w12, w22, True))
    o3 = jax.block_until_ready(
        downsample1d_pallas(x3, w12, w22, True, max_block_bytes=64 * 1024))
    assert o3.shape == (2, C2, L3 // 2), o3.shape
    np.testing.assert_allclose(np.asarray(o3), ref3, rtol=3e-2, atol=3e-2)

    print("KERNEL_OK")
</pallas_src>

<mosaic_0001>
module attributes {stable_mosaic.version = 11 : i64} {
  func.func @_downsample_kernel_kfill(%arg0: i32, %arg1: i32, %arg2: memref<1x8x256xbf16, #tpu.memory_space<vmem>>, %arg3: memref<128x256xbf16, #tpu.memory_space<vmem>>, %arg4: memref<1x128x8xf32, #tpu.memory_space<vmem>>) attributes {dimension_semantics = [#tpu.dimension_semantics<parallel>, #tpu.dimension_semantics<parallel>], iteration_bounds = array<i64: 2, 1>, scalar_prefetch = 0 : i64, scratch_operands = 0 : i64, tpu.core_type = #tpu.core_type<tc>, window_params = [{transform_indices = @transform_0, window_bounds = array<i64: 1, 8, 256>}, {pipeline_mode = #tpu.pipeline_mode<synchronous>, transform_indices = @transform_1, window_bounds = array<i64: 128, 256>}, {transform_indices = @transform_2, window_bounds = array<i64: 1, 128, 8>}]} {
    %c0 = arith.constant 0 : index
    %c0_0 = arith.constant 0 : index
    %0 = vector.load %arg3[%c0, %c0_0] : memref<128x256xbf16, #tpu.memory_space<vmem>>, vector<128x256xbf16>
    %c0_1 = arith.constant 0 : index
    %c0_2 = arith.constant 0 : index
    %c0_3 = arith.constant 0 : index
    %1 = vector.load %arg2[%c0_1, %c0_2, %c0_3] : memref<1x8x256xbf16, #tpu.memory_space<vmem>>, vector<1x8x256xbf16>
    %2 = vector.shape_cast %1 : vector<1x8x256xbf16> to vector<8x256xbf16>
    %cst = arith.constant dense<0.000000e+00> : vector<128x8xf32>
    %3 = tpu.matmul %0, %2, %cst {dimension_numbers = #tpu.dot_dimension_numbers<[1], [1], [0], [0], [0, 0, 1, 0], [], []>} : vector<128x256xbf16>, vector<8x256xbf16>, vector<128x8xf32> -> vector<128x8xf32>
    %c0_4 = arith.constant 0 : index
    %c0_5 = arith.constant 0 : index
    %c0_6 = arith.constant 0 : index
    %4 = vector.load %arg4[%c0_4, %c0_5, %c0_6] : memref<1x128x8xf32, #tpu.memory_space<vmem>>, vector<1x128x8xf32>
    %5 = vector.shape_cast %4 : vector<1x128x8xf32> to vector<128x8xf32>
    %6 = vector.shape_cast %3 : vector<128x8xf32> to vector<1x128x8xf32>
    tpu.vector_store %arg4[%c0_4, %c0_5, %c0_6], %6 {strides = array<i32>} : memref<1x128x8xf32, #tpu.memory_space<vmem>>, vector<1x128x8xf32>,
    return
  }
  func.func @transform_0(%arg0: i32, %arg1: i32) -> (i32, i32, i32) {
    %c0_i32 = arith.constant 0 : i32
    %c0_i32_0 = arith.constant 0 : i32
    return %arg0, %arg1, %c0_i32 : i32, i32, i32
  }
  func.func @transform_1(%arg0: i32, %arg1: i32) -> (i32, i32) {
    %c0_i32 = arith.constant 0 : i32
    %c0_i32_0 = arith.constant 0 : i32
    %c0_i32_1 = arith.constant 0 : i32
    return %c0_i32, %c0_i32_0 : i32, i32
  }
  func.func @transform_2(%arg0: i32, %arg1: i32) -> (i32, i32, i32) {
    %c0_i32 = arith.constant 0 : i32
    %c0_i32_0 = arith.constant 0 : i32
    return %arg0, %c0_i32, %arg1 : i32, i32, i32
  }
}

</mosaic_0001>

<bundles_post_ra>
// kernel: tpu_custom_call.1
= control target key start
LH: loop header
LB: loop body
LE: loop exit
PB: predicated region body
PF: predicated region fallthrough
CT: control target
= control target key end

     0   :  { %7 = vsyncpa [#allocation3], 0  ;;  %s975_s0 = inlined_call_operand.hbm [shape: bf16[2,8,256], index: 0, kind: input, shape index: {}]   ;;  %s976_s1 = inlined_call_operand.hbm [shape: bf16[128,256], index: 1, kind: input, shape index: {}]   ;;  %s977_s2 = inlined_call_operand.vmem [shape: f32[2,128,8], index: 2, kind: output, shape index: {}]  }
   0x1   :  { %9 = vsyncpa [#allocation3 + $0x1], 0 }
   0x2   :  { %10 = vsyncpa [#allocation5], 0  ;;  %s786_s9 = smov 0   ;;  %s788_s10 = smov 0  }
   0x3   :  { %s790_s11 = smov 0   ;;  %s792_s12 = smov 0  }
   0x4   :  { %s794_s13 = smov 0   ;;  %s796_s14 = smov 0  }
   0x5 LB: > { %s522_s15 = sadd.s32 4294967295, %s765_s14   ;;  %p50_p0 = scmp.ne.s32.totalorder %s749_s10, %s745_s9  ;;  %s765_s14 = sphi %s796_s14, %s16_s14   ;;  %s761_s13 = sphi %s794_s13, %s994_s13   ;;  %s757_s12 = sphi %s792_s12, %s993_s12   ;;  %s753_s11 = sphi %s790_s11, %s992_s11   ;;  %s749_s10 = sphi %s788_s10, %s991_s10   ;;  %s745_s9 = sphi %s786_s9, %s990_s9  }
   0x6   : > { %p816_p1 = scmp.eq.s32.totalorder %s522_s15, 0  ;;  %p524_p2 = scmp.ge.s32.totalorder %s765_s14, 1 }
   0x7   : > { %p110_p3 = scmp.lt.s32.totalorder %s765_s14, 3  ;;  %s767_s19 = smov [#allocation4]  }
   0x8   : > { %s982_s16 = scalar_select %p816_p1, 1, 0 }
   0x9   : > { %p824_p4 = por %p816_p1, %p50_p0  ;;  %p828_p5 = pnand %p524_p2, %p110_p3 }
   0xa   : > { %s122_s20 = sshll.u32 %s767_s19, 4  ;;  %s28_s22 = sadd.s32 1, %s761_s13  ;;  %s123_s20 = int_to_ptr.vmem [resolvable:$true] %s122_s20 }
   0xb   : > { %s983_s17 = scalar_select %p824_p4, 1, 0 }
   0xc   : > { %s984_s18 = scalar_select %p828_p5, 1, 0 }
   0xd   : > { %p565_p6 = pneg %p828_p5  ;;  %s653_s25 = scalar_lea.hbm %s976_s1, 2048 }
   0xe   : > { %p654_p8 = scmp.ne.s32.totalorder %s976_s1, %s653_s25  ;;  %p660_p12 = scmp.lt.u32.totalorder %s653_s25, %s976_s1 }
   0xf   : > { %p836_p7 = pnand %p565_p6, %p816_p1 }
  0x11   : > { %p655_p9 = pneg %p836_p7 }
  0x13   : > { %p656_p10 = pnand %p655_p9, %p654_p8 }
  0x15   : > { %p657_p11 = pneg %p656_p10 }
  0x17   : > { %p662_p13 = pnand %p660_p12, %p657_p11 }
  0x19   : > { %665 = shalt.err (!%p662_p13)
}
  0x1a   : > { %s666_s30 = scalar_lea.vmem %s123_s20, 2048  ;;  %p674_p6 = scmp.lt.s32.totalorder %s123_s20, %s123_s20 }
  0x1b   : > { %p667_p0 = scmp.ne.s32.totalorder %s123_s20, %s666_s30  ;;  %p675_p1 = scmp.lt.s32.totalorder %s666_s30, %s666_s30 }
  0x1d   : > { %p669_p2 = pnand %p667_p0, %p655_p9  ;;  %p676_p4 = por %p675_p1, %p674_p6 }
  0x1f   : > { %p670_p3 = pneg %p669_p2 }
  0x21   : > { %p677_p5 = pnand %p676_p4, %p670_p3 }
  0x23   : > { %680 = shalt.err (!%p677_p5)
}
  0x24   : > { %s768_s3 = smov 128   ;;  %s769_s4 = smov 8  }
  0x25   : > { %568 = dma.hbm_to_vmem [thread:$0]  (!%p836_p7), %s976_s1, 2048, %s123_s20, [#allocation5], %s768_s3, %s768_s3, %s769_s4  }
  0x26   : > { %p30_p1 = scmp.ge.s32.totalorder %s28_s22, 2  ;;  %s37_s7 = sadd.s32 1, %s753_s11 }
  0x27   : > { %p44_p4 = scmp.ne.s32.totalorder %s753_s11, %s749_s10  ;;  %p45_p5 = scmp.eq.s32.totalorder %s765_s14, 0 }
  0x28   : > { %s996_s22 = smov (%p30_p1, %s28_s22), 0  ;;  %p574_p9 = scmp.lt.s32.totalorder %s765_s14, 2 }
  0x29   : > { %p46_p8 = por %p45_p5, %p44_p4  ;;  %s32_s8 = ssub.s32 %s761_s13, %s996_s22 }
  0x2a   : > { %s136_s9 = sand.u32 1, %s753_s11   ;;  %p35_p10 = scmp.eq.s32.totalorder %s32_s8, 0 }
  0x2b   : > { %s527_s15 = sshll.u32 %s136_s9, 3  ;;  %s555_s19 = sshll.u32 %s761_s13, 7 }
  0x2c   : > { %s869_s23 = scalar_select %p35_p10, %s753_s11, %s37_s7  }
  0x2d   : > { %s874_s20 = scalar_lea.hbm %s975_s0, %s555_s19  ;;  %s140_s25 = scalar_lea.vmem [#allocation2], %s527_s15 }
  0x2e   : > { %s150_s26 = sshll.u32 %s140_s25, 4  ;;  %p876_p7 = pnand %p574_p9, %p46_p8  ;;  %s880_s26 = int_to_ptr.vmem [resolvable:$true] %s150_s26 }
  0x2f   : > { %s137_s28 = scalar_lea.sflag [#allocation3], %s136_s9  ;;  %s681_s29 = scalar_lea.hbm %s874_s20, 128 }
  0x30   : > { %p682_p11 = scmp.ne.s32.totalorder %s874_s20, %s681_s29  ;;  %p683_p12 = pneg %p876_p7 }
  0x31   : > { %s686_s4 = scalar_lea.hbm %s975_s0, 256  ;;  %p687_p2 = scmp.lt.u32.totalorder %s874_s20, %s975_s0 }
  0x32   : > { %p684_p13 = pnand %p683_p12, %p682_p11  ;;  %p688_p3 = scmp.lt.u32.totalorder %s686_s4, %s681_s29 }
  0x33   : > { %p690_p1 = scmp.lt.u32.totalorder %s681_s29, %s874_s20 }
  0x34   : > { %p685_p0 = pneg %p684_p13  ;;  %p689_p6 = por %p688_p3, %p687_p2 }
  0x36   : > { %p691_p4 = por %p690_p1, %p689_p6 }
  0x38   : > { %p692_p5 = pnand %p691_p4, %p685_p0 }
  0x3a   : > { %695 = shalt.err (!%p692_p5)
}
  0x3b   : > { %s696_s7 = scalar_lea.vmem %s880_s26, 128  ;;  %s770_s8 = smov [#allocation2]  }
  0x3c   : > { %p697_p8 = scmp.ne.s32.totalorder %s880_s26, %s696_s7  ;;  %s701_s9 = sshll.u32 %s770_s8, 4  ;;  %s702_s9 = int_to_ptr.vmem [resolvable:$false] %s701_s9 }
  0x3d   : > { %s703_s15 = scalar_lea.vmem %s702_s9, 256  ;;  %p704_p11 = scmp.lt.s32.totalorder %s880_s26, %s702_s9 }
  0x3e   : > { %p699_p9 = pnand %p697_p8, %p683_p12  ;;  %p705_p13 = scmp.lt.s32.totalorder %s703_s15, %s696_s7 }
  0x40   : > { %p700_p10 = pneg %p699_p9  ;;  %p706_p2 = por %p705_p13, %p704_p11 }
  0x42   : > { %p707_p3 = pnand %p706_p2, %p700_p10 }
  0x44   : > { %710 = shalt.err (!%p707_p3)
}
  0x45   : > { %572 = dma.hbm_to_vmem [thread:$0]  (!%p876_p7), %s874_s20, 128, %s880_s26, %s137_s28  }
  0x46   : > { %p987_p0 = scmp.ne.s32.totalorder %s984_s18, 0 }
  0x47   : > { %s161_s19 = sand.u32 (!%p987_p0), 1, %s749_s10   ;;  %p988_p12 = scmp.ne.s32.totalorder (!%p987_p0), %s983_s17, 0 }
  0x48   : > { %159 = sbr.rel (%p987_p0) target bundleno = 333 (0x14d), region = 28  ;;  %s531_s21 = sshll.u32 (!%p987_p0), %s161_s19, 3 }
  0x49   : > { %s162_s24 = scalar_lea.sflag (!%p987_p0), [#allocation3], %s161_s19  ;;  %s165_s25 = scalar_lea.vmem (!%p987_p0), [#allocation2], %s531_s21 }
  0x4f   : > { %736 = dma.done.wait (%p988_p12), %s162_s24, 128  }
  0x50   : > { %738 = vsyncadd (%p988_p12), %s162_s24, 4294967168  ;;  %p989_p6 = scmp.ne.s32.totalorder %s982_s16, 0 }
  0x52   : > { %740 = dma.done.wait (%p989_p6), [#allocation5], 2048  }
  0x53   : > { %742 = vsyncadd (%p989_p6), [#allocation5], 4294965248  ;;  %v218_v0 = vld [vmem:[%s165_s25] sm:$0xff]  ;;  %v631_v3 = vld [vmem:[#allocation4 + $0x4] ss:$8 sps:$4 sm:$0xff]   ;;  %p193_p7 = scmp.lt.s32.totalorder %s757_s12, 1 }
  0x54   : > { %v552_v1 = vcombine.high %v218_v0, %v218_v0  ;;  %v551_v2 = vcombine.low %v218_v0, %v218_v0  ;;  %v634_v4 = vld [vmem:[#allocation4 + $0x44] ss:$8 sps:$4 sm:$0xff]   ;;  %338 = vmatprep.mubr.bf16.mxu0 %v631_v3  ;;  %v629_v5 = vld [vmem:[#allocation4] ss:$8 sps:$4 sm:$0xff]   ;;  %v635_v7 = vld [vmem:[#allocation4 + $0x14] ss:$8 sps:$4 sm:$0xff]  }
  0x55   : > { %370 = vmatprep.mubr.bf16.mxu1 %v634_v4  ;;  %v632_v6 = vld [vmem:[#allocation4 + $0x40] ss:$8 sps:$4 sm:$0xff]   ;;  %v637_v8 = vld [vmem:[#allocation4 + $0x54] ss:$8 sps:$4 sm:$0xff]   ;;  %v639_v9 = vld [vmem:[#allocation4 + $0x10] ss:$8 sps:$4 sm:$0xff]  }
  0x56   : > { %306 = vmatprep.subr.bf16.mxu0 %v552_v1  ;;  %557 = vmatprep.subr.bf16.mxu1 %v552_v1  ;;  %v640_v10 = vld [vmem:[#allocation4 + $0x50] ss:$8 sps:$4 sm:$0xff]   ;;  %v641_v11 = vld [vmem:[#allocation4 + $0x24] ss:$8 sps:$4 sm:$0xff]   ;;  %v645_v13 = vld [vmem:[#allocation4 + $0x20] ss:$8 sps:$4 sm:$0xff]  }
  0x57   : > { %307 = vmatpush1.bf16.xpose.msra.mxu0 %v551_v2  ;;  %558 = vmatpush1.bf16.xpose.msra.mxu1 %v551_v2  ;;  %v643_v12 = vld [vmem:[#allocation4 + $0x64] ss:$8 sps:$4 sm:$0xff]   ;;  %v646_v14 = vld [vmem:[#allocation4 + $0x60] ss:$8 sps:$4 sm:$0xff]   ;;  %v647_v15 = vld [vmem:[#allocation4 + $0x34] ss:$8 sps:$4 sm:$0xff]  }
  0x58   : > { %v649_v16 = vld [vmem:[#allocation4 + $0x74] ss:$8 sps:$4 sm:$0xff]   ;;  %v651_v17 = vld [vmem:[#allocation4 + $0x30] ss:$8 sps:$4 sm:$0xff]   ;;  %s998_s12 = smov (!%p193_p7, %s757_s12), 1  ;;  %vm403_vm0 = vcmask 64512  }
  0x59   : > { %v652_v18 = vld [vmem:[#allocation4 + $0x70] ss:$8 sps:$4 sm:$0xff]   ;;  %s556_s16 = sshll.u32 %s998_s12, 7 }
  0x5a   : > { %s923_s20 = scalar_lea.vmem %s977_s2, %s556_s16 }
  0x5e   : > { %339 = vmatmul.mubr.bf16.vlgmr.msra.gmra.mrb[0].mxu0 %v629_v5  ;;  %371 = vmatmul.mubr.bf16.vlgmr.msra.gmra.mrb[0].mxu1 %v632_v6 }
  0x5f   : > { %346 = vmatprep.mubr.bf16.mxu0 %v635_v7  ;;  %378 = vmatprep.mubr.bf16.mxu1 %v637_v8 }
  0x66   : > { %347 = vmatmul.mubr.bf16.gmra.mrb[4].mxu0 %v639_v9  ;;  %379 = vmatmul.mubr.bf16.gmra.mrb[4].mxu1 %v640_v10 }
  0x67   : > { %354 = vmatprep.mubr.bf16.mxu0 %v641_v11  ;;  %386 = vmatprep.mubr.bf16.mxu1 %v643_v12 }
  0x6e   : > { %355 = vmatmul.mubr.bf16.gmra.mrb[8].mxu0 %v645_v13  ;;  %387 = vmatmul.mubr.bf16.gmra.mrb[8].mxu1 %v646_v14 }
  0x6f   : > { %362 = vmatprep.mubr.bf16.mxu0 %v647_v15  ;;  %394 = vmatprep.mubr.bf16.mxu1 %v649_v16 }
  0x76   : > { %363 = vmatmul.mubr.bf16.gmra.mrb[12].mxu0 %v651_v17  ;;  %395 = vmatmul.mubr.bf16.gmra.mrb[12].mxu1 %v652_v18 }
 0x131   : > { %v340_v19 = vpop.f32.mrb[0].mxu0  ;;  %v372_v20 = vpop.f32.mrb[0].mxu1 }
 0x132   : > { %404 = vst.msk [vmem:[%s923_s20] sm:$0xff] %vm403_vm0, %v340_v19  ;;  %412 = vst.msk [vmem:[%s923_s20 + $0x40] sm:$0xff] %vm403_vm0, %v372_v20  ;;  %v342_v21 = vpop.f32.mrb[1].mxu0  ;;  %v374_v22 = vpop.f32.mrb[1].mxu1 }
 0x133   : > { %v343_v23 = vpop.f32.mrb[2].mxu0  ;;  %v375_v24 = vpop.f32.mrb[2].mxu1 }
 0x134   : > { %405 = vst.msk [vmem:[%s923_s20 + $0x8] sm:$0xff] %vm403_vm0, %v343_v23  ;;  %413 = vst.msk [vmem:[%s923_s20 + $0x48] sm:$0xff] %vm403_vm0, %v375_v24  ;;  %v345_v25 = vpop.f32.mrb[3].mxu0  ;;  %v377_v26 = vpop.f32.mrb[3].mxu1 }
 0x139   : > { %v348_v27 = vpop.f32.mrb[4].mxu0  ;;  %v380_v28 = vpop.f32.mrb[4].mxu1 }
 0x13a   : > { %406 = vst.msk [vmem:[%s923_s20 + $0x10] sm:$0xff] %vm403_vm0, %v348_v27  ;;  %414 = vst.msk [vmem:[%s923_s20 + $0x50] sm:$0xff] %vm403_vm0, %v380_v28  ;;  %v350_v29 = vpop.f32.mrb[5].mxu0  ;;  %v382_v30 = vpop.f32.mrb[5].mxu1 }
 0x13b   : > { %v351_v31 = vpop.f32.mrb[6].mxu0  ;;  %v383_v32 = vpop.f32.mrb[6].mxu1 }
 0x13c   : > { %407 = vst.msk [vmem:[%s923_s20 + $0x18] sm:$0xff] %vm403_vm0, %v351_v31  ;;  %415 = vst.msk [vmem:[%s923_s20 + $0x58] sm:$0xff] %vm403_vm0, %v383_v32  ;;  %v353_v33 = vpop.f32.mrb[7].mxu0  ;;  %v385_v34 = vpop.f32.mrb[7].mxu1 }
 0x141   : > { %v356_v35 = vpop.f32.mrb[8].mxu0  ;;  %v388_v36 = vpop.f32.mrb[8].mxu1 }
 0x142   : > { %408 = vst.msk [vmem:[%s923_s20 + $0x20] sm:$0xff] %vm403_vm0, %v356_v35  ;;  %416 = vst.msk [vmem:[%s923_s20 + $0x60] sm:$0xff] %vm403_vm0, %v388_v36  ;;  %v358_v37 = vpop.f32.mrb[9].mxu0  ;;  %v390_v38 = vpop.f32.mrb[9].mxu1 }
 0x143   : > { %v359_v39 = vpop.f32.mrb[10].mxu0  ;;  %v391_v40 = vpop.f32.mrb[10].mxu1 }
 0x144   : > { %409 = vst.msk [vmem:[%s923_s20 + $0x28] sm:$0xff] %vm403_vm0, %v359_v39  ;;  %417 = vst.msk [vmem:[%s923_s20 + $0x68] sm:$0xff] %vm403_vm0, %v391_v40  ;;  %v361_v41 = vpop.f32.mrb[11].mxu0  ;;  %v393_v42 = vpop.f32.mrb[11].mxu1 }
 0x149   : > { %v364_v43 = vpop.f32.mrb[12].mxu0  ;;  %v396_v44 = vpop.f32.mrb[12].mxu1 }
 0x14a   : > { %410 = vst.msk [vmem:[%s923_s20 + $0x30] sm:$0xff] %vm403_vm0, %v364_v43  ;;  %418 = vst.msk [vmem:[%s923_s20 + $0x70] sm:$0xff] %vm403_vm0, %v396_v44  ;;  %v366_v45 = vpop.f32.mrb[13].mxu0  ;;  %v398_v46 = vpop.f32.mrb[13].mxu1 }
 0x14b   : > { %v367_v47 = vpop.f32.mrb[14].mxu0  ;;  %v399_v48 = vpop.f32.mrb[14].mxu1 }
 0x14c   : > { %411 = vst.msk [vmem:[%s923_s20 + $0x38] sm:$0xff] %vm403_vm0, %v367_v47  ;;  %419 = vst.msk [vmem:[%s923_s20 + $0x78] sm:$0xff] %vm403_vm0, %v399_v48  ;;  %v369_v49 = vpop.f32.mrb[15].mxu0  ;;  %v401_v50 = vpop.f32.mrb[15].mxu1 }
 0x14d PF: > { %s16_s14 = sadd.s32 1, %s765_s14   ;;  %s990_s9 = smov %s749_s10 }
 0x14e   : > { %p13_p1 = scmp.ge.s32.totalorder %s16_s14, 4   ;;  %s991_s10 = smov %s753_s11 }
 0x14f   : > { %s992_s11 = smov %s869_s23  ;;  %s993_s12 = smov %s761_s13 }
 0x150   : > { %s994_s13 = smov %s996_s22  ;;  %15 = sbr.rel (!%p13_p1) target bundleno = 5 (0x5), region = 72 }
 0x157   :  { %447 = vsyncpa [#allocation3], 1 }
 0x158   :  { %449 = vsyncpa [#allocation3 + $0x1], 1 }
 0x159   :  { %450 = vsyncpa [#allocation5], 1 }

</bundles_post_ra>
